<compile_context>
chip_gen: v7x
topology: tpu7x:2x2x1
jax: 0.10.0
libtpu: 0.0.40
codegen_flags: <defaults>
</compile_context>

<pallas_src>
import jax
import jax.numpy as jnp
from jax.experimental import pallas as pl
from jax.experimental.pallas import tpu as pltpu

K_IN = 28 * 28      # 784
K_PAD = 896         # 784 padded to 7 * 128
H1 = 128
H2 = 64
OUT = 10
OUT_PAD = 128       # 10 padded to a full lane width


def mlp_kernel(x_ref, w1_ref, b1_ref, w2_ref, b2_ref, w3_ref, b3_ref, o_ref):
    # x_ref: (TB, 896) bf16; weights bf16 in (in, out) layout; biases f32.
    x = x_ref[...]

    h1 = jnp.dot(x, w1_ref[...], preferred_element_type=jnp.float32) + b1_ref[...]
    h1 = jnp.maximum(h1, 0.0)                       # ReLU in f32 (VPU)

    h2 = jnp.dot(h1.astype(jnp.bfloat16), w2_ref[...],
                 preferred_element_type=jnp.float32) + b2_ref[...]
    h2 = jnp.maximum(h2, 0.0)                       # ReLU in f32

    h3 = jnp.dot(h2.astype(jnp.bfloat16), w3_ref[...],
                 preferred_element_type=jnp.float32) + b3_ref[...]
    o_ref[...] = h3.astype(o_ref.dtype)             # lane-dense (TB, 128) store


def _round_up(n, m):
    return ((n + m - 1) // m) * m


def neural_network_forward(x, params, *, batch_tile=256):
    """x: (B, 1, 28, 28) float32 (NCHW).  Returns (B, 10) float32 logits."""
    w1, b1, w2, b2, w3, b3 = params
    B = x.shape[0]
    x_flat = x.reshape(B, K_IN).astype(jnp.bfloat16)    # nn.Flatten() + bf16 cast

    # Batch tile: cap at `batch_tile`, keep it sublane-aligned, pad B up to it.
    TB = min(batch_tile, _round_up(B, 8))
    B_pad = _round_up(B, TB)

    # Zero-pad activations (batch and K) and the first/last layer weights.
    x_p = jnp.zeros((B_pad, K_PAD), jnp.bfloat16).at[:B, :K_IN].set(x_flat)
    w1_p = jnp.zeros((K_PAD, H1), jnp.bfloat16).at[:K_IN, :].set(w1.astype(jnp.bfloat16))
    w2_p = w2.astype(jnp.bfloat16)
    w3_p = jnp.zeros((H2, OUT_PAD), jnp.bfloat16).at[:, :OUT].set(w3.astype(jnp.bfloat16))
    b1_p = b1.astype(jnp.float32)
    b2_p = b2.astype(jnp.float32)
    b3_p = jnp.zeros((1, OUT_PAD), jnp.float32).at[:, :OUT].set(b3.astype(jnp.float32))

    grid = (B_pad // TB,)

    flops = 2 * B_pad * (K_PAD * H1 + H1 * H2 + H2 * OUT_PAD)
    bytes_accessed = (
        x_p.size * 2 + w1_p.size * 2 + w2_p.size * 2 + w3_p.size * 2
        + (b1_p.size + b2_p.size + b3_p.size) * 4
        + B_pad * OUT_PAD * 4
    )

    out = pl.pallas_call(
        mlp_kernel,
        out_shape=jax.ShapeDtypeStruct((B_pad, OUT_PAD), jnp.float32),
        grid_spec=pltpu.PrefetchScalarGridSpec(
            num_scalar_prefetch=0,
            grid=grid,
            in_specs=[
                # Activations: tiled over batch (pipelined tile-by-tile).
                pl.BlockSpec((TB, K_PAD), lambda i: (i, 0)),
                # Weights/biases: constant index_map -> VMEM-resident, DMA'd once.
                pl.BlockSpec((K_PAD, H1), lambda i: (0, 0)),
                pl.BlockSpec((1, H1), lambda i: (0, 0)),
                pl.BlockSpec((H1, H2), lambda i: (0, 0)),
                pl.BlockSpec((1, H2), lambda i: (0, 0)),
                pl.BlockSpec((H2, OUT_PAD), lambda i: (0, 0)),
                pl.BlockSpec((1, OUT_PAD), lambda i: (0, 0)),
            ],
            out_specs=pl.BlockSpec((TB, OUT_PAD), lambda i: (i, 0)),
        ),
        compiler_params=pltpu.CompilerParams(
            dimension_semantics=("parallel",),       # shards batch tiles across TCs (v7x)
            vmem_limit_bytes=48 * 1024 * 1024,
        ),
        cost_estimate=pl.CostEstimate(
            flops=flops, transcendentals=0, bytes_accessed=bytes_accessed),
    )(x_p, w1_p, b1_p, w2_p, b2_p, w3_p, b3_p)

    return out[:B, :OUT]


def init_params(key):
    """Deterministic init matching nn.Linear shapes; weights stored as
    (in_features, out_features) so the kernel computes x @ W + b."""
    k1, k2, k3, k4, k5, k6 = jax.random.split(key, 6)

    def linear(kw, kb, fan_in, fan_out):
        bound = 1.0 / jnp.sqrt(fan_in)
        w = jax.random.uniform(kw, (fan_in, fan_out), jnp.float32, -bound, bound)
        b = jax.random.uniform(kb, (1, fan_out), jnp.float32, -bound, bound)
        return w, b

    w1, b1 = linear(k1, k2, K_IN, H1)
    w2, b2 = linear(k3, k4, H1, H2)
    w3, b3 = linear(k5, k6, H2, OUT)
    return (w1, b1, w2, b2, w3, b3)


def reference_forward(x, params):
    """Pure-JAX f32 reference for correctness check."""
    w1, b1, w2, b2, w3, b3 = params
    h = x.reshape(x.shape[0], -1)
    h = jnp.maximum(h @ w1 + b1, 0.0)
    h = jnp.maximum(h @ w2 + b2, 0.0)
    return h @ w3 + b3


if __name__ == "__main__":
    key = jax.random.PRNGKey(0)
    kx, kp = jax.random.split(key)

    B = 8
    x = jax.random.normal(kx, (B, 1, 28, 28), jnp.float32)  # NCHW, MNIST-shaped
    params = init_params(kp)

    out = neural_network_forward(x, params)
    out = jax.block_until_ready(out)

    ref = reference_forward(x, params)
    assert out.shape == (B, OUT)
    # bf16 inputs/weights with f32 MXU accumulation -> widened tolerance.
    assert jnp.allclose(out, ref, atol=3e-2, rtol=3e-2)

    print("KERNEL_OK")
</pallas_src>

<mosaic_0001>
module attributes {stable_mosaic.version = 11 : i64} {
  func.func @mlp_kernel(%arg0: i32, %arg1: memref<8x896xbf16, #tpu.memory_space<vmem>>, %arg2: memref<896x128xbf16, #tpu.memory_space<vmem>>, %arg3: memref<1x128xf32, #tpu.memory_space<vmem>>, %arg4: memref<128x64xbf16, #tpu.memory_space<vmem>>, %arg5: memref<1x64xf32, #tpu.memory_space<vmem>>, %arg6: memref<64x128xbf16, #tpu.memory_space<vmem>>, %arg7: memref<1x128xf32, #tpu.memory_space<vmem>>, %arg8: memref<8x128xf32, #tpu.memory_space<vmem>>) attributes {dimension_semantics = [#tpu.dimension_semantics<parallel>], iteration_bounds = array<i64: 1>, scalar_prefetch = 0 : i64, scratch_operands = 0 : i64, tpu.core_type = #tpu.core_type<tc>, window_params = [{transform_indices = @transform_0, window_bounds = array<i64: 8, 896>}, {pipeline_mode = #tpu.pipeline_mode<synchronous>, transform_indices = @transform_1, window_bounds = array<i64: 896, 128>}, {pipeline_mode = #tpu.pipeline_mode<synchronous>, transform_indices = @transform_2, window_bounds = array<i64: 1, 128>}, {pipeline_mode = #tpu.pipeline_mode<synchronous>, transform_indices = @transform_3, window_bounds = array<i64: 128, 64>}, {pipeline_mode = #tpu.pipeline_mode<synchronous>, transform_indices = @transform_4, window_bounds = array<i64: 1, 64>}, {pipeline_mode = #tpu.pipeline_mode<synchronous>, transform_indices = @transform_5, window_bounds = array<i64: 64, 128>}, {pipeline_mode = #tpu.pipeline_mode<synchronous>, transform_indices = @transform_6, window_bounds = array<i64: 1, 128>}, {transform_indices = @transform_7, window_bounds = array<i64: 8, 128>}]} {
    %c0 = arith.constant 0 : index
    %c0_0 = arith.constant 0 : index
    %0 = vector.load %arg1[%c0, %c0_0] : memref<8x896xbf16, #tpu.memory_space<vmem>>, vector<8x896xbf16>
    %c0_1 = arith.constant 0 : index
    %c0_2 = arith.constant 0 : index
    %1 = vector.load %arg2[%c0_1, %c0_2] : memref<896x128xbf16, #tpu.memory_space<vmem>>, vector<896x128xbf16>
    %cst = arith.constant dense<0.000000e+00> : vector<8x128xf32>
    %2 = tpu.matmul %0, %1, %cst {dimension_numbers = #tpu.dot_dimension_numbers<[1], [0], [0], [1], [0, 0, 1, 1], [], []>} : vector<8x896xbf16>, vector<896x128xbf16>, vector<8x128xf32> -> vector<8x128xf32>
    %c0_3 = arith.constant 0 : index
    %c0_4 = arith.constant 0 : index
    %3 = vector.load %arg3[%c0_3, %c0_4] : memref<1x128xf32, #tpu.memory_space<vmem>>, vector<1x128xf32>
    %4 = vector.broadcast %3 : vector<1x128xf32> to vector<8x128xf32>
    %5 = arith.addf %2, %4 : vector<8x128xf32>
    %cst_5 = arith.constant 0.000000e+00 : f32
    %6 = vector.broadcast %cst_5 : f32 to vector<8x128xf32>
    %7 = arith.maximumf %5, %6 : vector<8x128xf32>
    %8 = arith.truncf %7 : vector<8x128xf32> to vector<8x128xbf16>
    %c0_6 = arith.constant 0 : index
    %c0_7 = arith.constant 0 : index
    %9 = vector.load %arg4[%c0_6, %c0_7] : memref<128x64xbf16, #tpu.memory_space<vmem>>, vector<128x64xbf16>
    %cst_8 = arith.constant dense<0.000000e+00> : vector<8x64xf32>
    %10 = tpu.matmul %8, %9, %cst_8 {dimension_numbers = #tpu.dot_dimension_numbers<[1], [0], [0], [1], [0, 0, 1, 1], [], []>} : vector<8x128xbf16>, vector<128x64xbf16>, vector<8x64xf32> -> vector<8x64xf32>
    %c0_9 = arith.constant 0 : index
    %c0_10 = arith.constant 0 : index
    %11 = vector.load %arg5[%c0_9, %c0_10] : memref<1x64xf32, #tpu.memory_space<vmem>>, vector<1x64xf32>
    %12 = vector.broadcast %11 : vector<1x64xf32> to vector<8x64xf32>
    %13 = arith.addf %10, %12 : vector<8x64xf32>
    %cst_11 = arith.constant 0.000000e+00 : f32
    %14 = vector.broadcast %cst_11 : f32 to vector<8x64xf32>
    %15 = arith.maximumf %13, %14 : vector<8x64xf32>
    %16 = arith.truncf %15 : vector<8x64xf32> to vector<8x64xbf16>
    %c0_12 = arith.constant 0 : index
    %c0_13 = arith.constant 0 : index
    %17 = vector.load %arg6[%c0_12, %c0_13] : memref<64x128xbf16, #tpu.memory_space<vmem>>, vector<64x128xbf16>
    %cst_14 = arith.constant dense<0.000000e+00> : vector<8x128xf32>
    %18 = tpu.matmul %16, %17, %cst_14 {dimension_numbers = #tpu.dot_dimension_numbers<[1], [0], [0], [1], [0, 0, 1, 1], [], []>} : vector<8x64xbf16>, vector<64x128xbf16>, vector<8x128xf32> -> vector<8x128xf32>
    %c0_15 = arith.constant 0 : index
    %c0_16 = arith.constant 0 : index
    %19 = vector.load %arg7[%c0_15, %c0_16] : memref<1x128xf32, #tpu.memory_space<vmem>>, vector<1x128xf32>
    %20 = vector.broadcast %19 : vector<1x128xf32> to vector<8x128xf32>
    %21 = arith.addf %18, %20 : vector<8x128xf32>
    %c0_17 = arith.constant 0 : index
    %c0_18 = arith.constant 0 : index
    %22 = vector.load %arg8[%c0_17, %c0_18] : memref<8x128xf32, #tpu.memory_space<vmem>>, vector<8x128xf32>
    tpu.vector_store %arg8[%c0_17, %c0_18], %21 {strides = array<i32>} : memref<8x128xf32, #tpu.memory_space<vmem>>, vector<8x128xf32>,
    return
  }
  func.func @transform_0(%arg0: i32) -> (i32, i32) {
    %c0_i32 = arith.constant 0 : i32
    %c0_i32_0 = arith.constant 0 : i32
    return %arg0, %c0_i32 : i32, i32
  }
  func.func @transform_1(%arg0: i32) -> (i32, i32) {
    %c0_i32 = arith.constant 0 : i32
    %c0_i32_0 = arith.constant 0 : i32
    %c0_i32_1 = arith.constant 0 : i32
    return %c0_i32, %c0_i32_0 : i32, i32
  }
  func.func @transform_2(%arg0: i32) -> (i32, i32) {
    %c0_i32 = arith.constant 0 : i32
    %c0_i32_0 = arith.constant 0 : i32
    %c0_i32_1 = arith.constant 0 : i32
    return %c0_i32, %c0_i32_0 : i32, i32
  }
  func.func @transform_3(%arg0: i32) -> (i32, i32) {
    %c0_i32 = arith.constant 0 : i32
    %c0_i32_0 = arith.constant 0 : i32
    %c0_i32_1 = arith.constant 0 : i32
    return %c0_i32, %c0_i32_0 : i32, i32
  }
  func.func @transform_4(%arg0: i32) -> (i32, i32) {
    %c0_i32 = arith.constant 0 : i32
    %c0_i32_0 = arith.constant 0 : i32
    %c0_i32_1 = arith.constant 0 : i32
    return %c0_i32, %c0_i32_0 : i32, i32
  }
  func.func @transform_5(%arg0: i32) -> (i32, i32) {
    %c0_i32 = arith.constant 0 : i32
    %c0_i32_0 = arith.constant 0 : i32
    %c0_i32_1 = arith.constant 0 : i32
    return %c0_i32, %c0_i32_0 : i32, i32
  }
  func.func @transform_6(%arg0: i32) -> (i32, i32) {
    %c0_i32 = arith.constant 0 : i32
    %c0_i32_0 = arith.constant 0 : i32
    %c0_i32_1 = arith.constant 0 : i32
    return %c0_i32, %c0_i32_0 : i32, i32
  }
  func.func @transform_7(%arg0: i32) -> (i32, i32) {
    %c0_i32 = arith.constant 0 : i32
    %c0_i32_0 = arith.constant 0 : i32
    return %arg0, %c0_i32 : i32, i32
  }
}

</mosaic_0001>

<bundles_post_ra>
// kernel: tpu_custom_call.1
= control target key start
LH: loop header
LB: loop body
LE: loop exit
PB: predicated region body
PF: predicated region fallthrough
CT: control target
= control target key end

     0   :  { %12 = vsyncpa [#allocation3], 0  ;;  %s1402_s0 = inlined_call_operand.vmem [shape: bf16[8,896], index: 0, kind: input, shape index: {}]   ;;  %s1403_s1 = inlined_call_operand.hbm [shape: bf16[896,128], index: 1, kind: input, shape index: {}]   ;;  %s1404_s2 = inlined_call_operand.vmem [shape: f32[1,128], index: 2, kind: input, shape index: {}]   ;;  %s1405_s3 = inlined_call_operand.vmem [shape: bf16[128,64], index: 3, kind: input, shape index: {}]   ;;  %s1406_s4 = inlined_call_operand.vmem [shape: f32[1,64], index: 4, kind: input, shape index: {}]   ;;  %s1407_s5 = inlined_call_operand.vmem [shape: bf16[64,128], index: 5, kind: input, shape index: {}]   ;;  %s1408_s6 = inlined_call_operand.vmem [shape: f32[1,128], index: 6, kind: input, shape index: {}]   ;;  %s1409_s7 = inlined_call_operand.hbm [shape: f32[8,128], index: 7, kind: output, shape index: {}]  }
   0x1   :  { %13 = vsyncpa [#allocation4], 0  ;;  %s1249_s24 = smov [#allocation2]   ;;  %s1201_s28 = scalar_lea.hbm %s1403_s1, 7168 }
   0x2   :  { %s21_s25 = sshll.u32 %s1249_s24, 4  ;;  %p1202_p0 = scmp.ne.s32.totalorder %s1403_s1, %s1201_s28  ;;  %s22_s25 = int_to_ptr.vmem [resolvable:$true] %s21_s25 }
   0x3   :  { %p1205_p1 = scmp.lt.u32.totalorder %s1201_s28, %s1403_s1 }
   0x5   :  { %p1207_p2 = pnand %p1205_p1, %p1202_p0 }
   0x7   :  { %1210 = shalt.err (!%p1207_p2)
}
   0x8   :  { %s1211_s10 = scalar_lea.vmem %s22_s25, 7168  ;;  %p1216_p4 = scmp.lt.s32.totalorder %s22_s25, %s22_s25 }
   0x9   :  { %p1212_p3 = scmp.ne.s32.totalorder %s22_s25, %s1211_s10  ;;  %p1217_p5 = scmp.lt.s32.totalorder %s1211_s10, %s1211_s10 }
   0xb   :  { %p1218_p6 = por %p1217_p5, %p1216_p4 }
   0xd   :  { %p1219_p7 = pnand %p1218_p6, %p1212_p3 }
   0xf   :  { %1222 = shalt.err (!%p1219_p7)
}
  0x10   :  { %s1250_s11 = smov 64   ;;  %s1251_s12 = smov 4  }
  0x11   :  { %27 = dma.hbm_to_vmem [thread:$0]  %s1403_s1, 7168, %s22_s25, [#allocation3], %s1250_s11, %s1250_s11, %s1251_s12  }
  0x12   :  { %1245 = dma.done.wait [#allocation3], 7168  }
  0x13   :  { %1246 = vsyncadd [#allocation3], 4294960128  ;;  %v1126_v0 = vld [vmem:[#allocation2 + $0x40] sm:$0xff]   ;;  %v1130_v4 = vld [vmem:[#allocation2 + $0x48] sm:$0xff]   ;;  %v1252_v42 = vmov 0.0   ;;  %vm1253_vm0 = vmmov 0  }
  0x14   :  { %v1127_v1 = vld [vmem:[#allocation2] sm:$0xff]   ;;  %979 = vmatprep.subr.bf16.mxu0 %v1126_v0  ;;  %v1131_v5 = vld [vmem:[#allocation2 + $0x8] sm:$0xff]   ;;  %v1134_v8 = vld [vmem:[#allocation2 + $0x50] sm:$0xff]   ;;  %vm840_vm1 = vcmask 523264  }
  0x15   :  { %v1128_v2 = vld [vmem:[#allocation2 + $0xc0] sm:$0xff]   ;;  %980 = vmatpush3.bf16.msra.mxu0 %v1127_v1  ;;  %v1132_v6 = vld [vmem:[#allocation2 + $0xc8] sm:$0xff]   ;;  %v1135_v9 = vld [vmem:[#allocation2 + $0x10] sm:$0xff]  }
  0x16   :  { %v1129_v3 = vld [vmem:[#allocation2 + $0x80] sm:$0xff]   ;;  %1001 = vmatprep.subr.bf16.mxu1 %v1128_v2  ;;  %981 = vmatprep.subr.bf16.mxu0 %v1130_v4  ;;  %v1133_v7 = vld [vmem:[#allocation2 + $0x88] sm:$0xff]   ;;  %v1136_v10 = vld [vmem:[#allocation2 + $0xd0] sm:$0xff]  }
  0x17   :  { %1002 = vmatpush3.bf16.msra.mxu1 %v1129_v3  ;;  %v1137_v11 = vld [vmem:[#allocation2 + $0x90] sm:$0xff]   ;;  %v1138_v12 = vld [vmem:[#allocation2 + $0x58] sm:$0xff]   ;;  %v1142_v16 = vld [vmem:[#allocation2 + $0x60] sm:$0xff]  }
  0x18   :  { %1003 = vmatprep.subr.bf16.mxu1 %v1132_v6  ;;  %v1139_v13 = vld [vmem:[#allocation2 + $0x18] sm:$0xff]   ;;  %v1143_v17 = vld [vmem:[#allocation2 + $0x20] sm:$0xff]   ;;  %v1146_v20 = vld [vmem:[#allocation2 + $0x68] sm:$0xff]  }
  0x19   :  { %982 = vmatpush3.bf16.msra.mxu0 %v1131_v5  ;;  %v1140_v14 = vld [vmem:[#allocation2 + $0xd8] sm:$0xff]   ;;  %v1144_v18 = vld [vmem:[#allocation2 + $0xe0] sm:$0xff]   ;;  %v1147_v21 = vld [vmem:[#allocation2 + $0x28] sm:$0xff]  }
  0x1a   :  { %983 = vmatprep.subr.bf16.mxu0 %v1134_v8  ;;  %v1141_v15 = vld [vmem:[#allocation2 + $0x98] sm:$0xff]   ;;  %v1145_v19 = vld [vmem:[#allocation2 + $0xa0] sm:$0xff]   ;;  %v1148_v22 = vld [vmem:[#allocation2 + $0xe8] sm:$0xff]  }
  0x1b   :  { %1004 = vmatpush3.bf16.msra.mxu1 %v1133_v7  ;;  %v1149_v23 = vld [vmem:[#allocation2 + $0xa8] sm:$0xff]   ;;  %v1150_v24 = vld [vmem:[#allocation2 + $0x70] sm:$0xff]   ;;  %v1154_v28 = vld [vmem:[#allocation2 + $0x78] sm:$0xff]  }
  0x1c   :  { %1005 = vmatprep.subr.bf16.mxu1 %v1136_v10  ;;  %v1151_v25 = vld [vmem:[#allocation2 + $0x30] sm:$0xff]   ;;  %v1155_v29 = vld [vmem:[#allocation2 + $0x38] sm:$0xff]   ;;  %v42_v31 = vld [vmem:[%s1402_s0] sm:$0xff] }
  0x1d   :  { %984 = vmatpush3.bf16.msra.mxu0 %v1135_v9  ;;  %v1152_v26 = vld [vmem:[#allocation2 + $0xf0] sm:$0xff]   ;;  %v1156_v30 = vld [vmem:[#allocation2 + $0xf8] sm:$0xff]   ;;  %v901_v32 = vcombine.low %v42_v31, %v42_v31  ;;  %v902_v33 = vcombine.high %v42_v31, %v42_v31  ;;  %v1160_v35 = vld [vmem:[#allocation2 + $0x140] sm:$0xff]  }
  0x1e   :  { %985 = vmatprep.subr.bf16.mxu0 %v1138_v12  ;;  %v1153_v27 = vld [vmem:[#allocation2 + $0xb0] sm:$0xff]   ;;  %v1159_v34 = vld [vmem:[#allocation2 + $0xb8] sm:$0xff]   ;;  %v43_v36 = vld [vmem:[%s1402_s0 + $0x8] sm:$0xff] }
  0x1f   :  { %1006 = vmatpush3.bf16.msra.mxu1 %v1137_v11  ;;  %558 = vmatprep.mubr.bf16.mxu0 %v902_v33  ;;  %v903_v37 = vcombine.low %v43_v36, %v43_v36  ;;  %v904_v38 = vcombine.high %v43_v36, %v43_v36  ;;  %v1163_v39 = vld [vmem:[#allocation2 + $0x100] sm:$0xff]   ;;  %v1165_v41 = vld [vmem:[#allocation2 + $0x148] sm:$0xff]   ;;  %v1168_v45 = vld [vmem:[#allocation2 + $0x150] sm:$0xff]  }
  0x20   :  { %1007 = vmatprep.subr.bf16.mxu1 %v1140_v14  ;;  %v1164_v40 = vld [vmem:[#allocation2 + $0x180] sm:$0xff]   ;;  %v1166_v43 = vld [vmem:[#allocation2 + $0x108] sm:$0xff]   ;;  %v1169_v46 = vld [vmem:[#allocation2 + $0x110] sm:$0xff]  }
  0x21   :  { %986 = vmatpush3.bf16.msra.mxu0 %v1139_v13  ;;  %598 = vmatprep.mubr.bf16.mxu1 %v904_v38  ;;  %v1167_v44 = vld [vmem:[#allocation2 + $0x188] sm:$0xff]   ;;  %v1170_v47 = vld [vmem:[#allocation2 + $0x190] sm:$0xff]   ;;  %v1171_v48 = vld [vmem:[#allocation2 + $0x158] sm:$0xff]  }
  0x22   :  { %987 = vmatprep.subr.bf16.mxu0 %v1142_v16  ;;  %v1172_v49 = vld [vmem:[#allocation2 + $0x118] sm:$0xff]   ;;  %v1174_v50 = vld [vmem:[#allocation2 + $0x160] sm:$0xff]   ;;  %v1177_v53 = vld [vmem:[#allocation2 + $0x168] sm:$0xff]  }
  0x23   :  { %1008 = vmatpush3.bf16.msra.mxu1 %v1141_v15  ;;  %v1173_v51 = vld [vmem:[#allocation2 + $0x198] sm:$0xff]   ;;  %v1175_v52 = vld [vmem:[#allocation2 + $0x120] sm:$0xff]   ;;  %v1178_v55 = vld [vmem:[#allocation2 + $0x128] sm:$0xff]  }
  0x24   :  { %1009 = vmatprep.subr.bf16.mxu1 %v1144_v18  ;;  %v1176_v54 = vld [vmem:[#allocation2 + $0x1a0] sm:$0xff]   ;;  %v1180_v56 = vld [vmem:[#allocation2 + $0x170] sm:$0xff]   ;;  %v1179_v57 = vld [vmem:[#allocation2 + $0x1a8] sm:$0xff]  }
  0x25   :  { %988 = vmatpush3.bf16.msra.mxu0 %v1143_v17  ;;  %v1181_v58 = vld [vmem:[#allocation2 + $0x130] sm:$0xff]   ;;  %v1183_v62 = vld [vmem:[#allocation2 + $0x178] sm:$0xff]   ;;  %v1189_v3 = vld [vmem:[%s1405_s3] sm:$0xff]  }
  0x26   :  { %989 = vmatprep.subr.bf16.mxu0 %v1146_v20  ;;  %v44_v59 = vld [vmem:[%s1402_s0 + $0x10] sm:$0xff]  ;;  %v1184_v63 = vld [vmem:[#allocation2 + $0x138] sm:$0xff]   ;;  %v1190_v4 = vld [vmem:[%s1405_s3 + $0x8] sm:$0xff]  }
  0x27   :  { %1010 = vmatpush3.bf16.msra.mxu1 %v1145_v19  ;;  %v1182_v60 = vld [vmem:[#allocation2 + $0x1b0] sm:$0xff]   ;;  %v906_v61 = vcombine.high %v44_v59, %v44_v59  ;;  %v1187_v0 = vld [vmem:[#allocation2 + $0x1b8] sm:$0xff]   ;;  %v905_v1 = vcombine.low %v44_v59, %v44_v59  ;;  %v1193_v7 = vld [vmem:[%s1405_s3 + $0x20] sm:$0xff]  }
  0x28   :  { %1011 = vmatprep.subr.bf16.mxu1 %v1148_v22  ;;  %v1188_v2 = vld [vmem:[%s1402_s0 + $0x18] ss:$0 sps:$4 sm:$0xff]   ;;  %v1191_v5 = vld [vmem:[%s1405_s3 + $0x10] sm:$0xff]   ;;  %v1194_v8 = vld [vmem:[%s1405_s3 + $0x28] sm:$0xff]   ;;  %s1254_s0 = smov [#allocation5]  }
  0x29   :  { %990 = vmatpush3.bf16.msra.mxu0 %v1147_v21  ;;  %v1192_v6 = vld [vmem:[%s1405_s3 + $0x18] sm:$0xff]   ;;  %v1195_v9 = vld [vmem:[%s1405_s3 + $0x30] sm:$0xff]   ;;  %v1197_v11 = vld [vmem:[%s1407_s5] sm:$0xff]  }
  0x2a   :  { %991 = vmatprep.subr.bf16.mxu0 %v1150_v24  ;;  %v1196_v10 = vld [vmem:[%s1405_s3 + $0x38] sm:$0xff]   ;;  %v1198_v12 = vld [vmem:[%s1407_s5 + $0x8] sm:$0xff]   ;;  %v900_v14 = vld [vmem:[%s1404_s2] ss:$0 sm:$0xff] }
  0x2b   :  { %1012 = vmatpush3.bf16.msra.mxu1 %v1149_v23 }
  0x2c   :  { %1013 = vmatprep.subr.bf16.mxu1 %v1152_v26 }
  0x2d   :  { %992 = vmatpush3.bf16.msra.mxu0 %v1151_v25 }
  0x2e   :  { %993 = vmatprep.subr.bf16.mxu0 %v1154_v28 }
  0x2f   :  { %1014 = vmatpush3.bf16.msra.mxu1 %v1153_v27 }
  0x30   :  { %1015 = vmatprep.subr.bf16.mxu1 %v1156_v30 }
  0x31   :  { %994 = vmatpush3.bf16.msra.mxu0 %v1155_v29 }
  0x32   :  { %1023 = vmatprep.subr.bf16.mxu0 %v1160_v35 }
  0x33   :  { %1016 = vmatpush3.bf16.msra.mxu1 %v1159_v34 }
  0x34   :  { %559 = vmatmul.mubr.bf16.vlgmr.msra.gmra.mrb[0].mxu0 %v901_v32  ;;  %1068 = vmatprep.subr.bf16.mxu1 %v1252_v42 }
  0x35   :  { %1024 = vmatpush3.bf16.msra.mxu0 %v1163_v39  ;;  %638 = vmatprep.mubr.bf16.mxu0 %v906_v61  ;;  %v1199_v39 = vld [vmem:[%s1407_s5 + $0x10] sm:$0xff]  }
  0x36   :  { %599 = vmatmul.mubr.bf16.vlgmr.msra.gmra.mrb[0].mxu1 %v903_v37  ;;  %1025 = vmatprep.subr.bf16.mxu0 %v1165_v41  ;;  %v964_v41 = vld [vmem:[%s1406_s4] ss:$0 sm:$0xff] }
  0x37   :  { %1069 = vmatpush3.bf16.msra.mxu1 %v1164_v40  ;;  %1084 = vmatprep.mubr.msk.bf16.mxu1 %vm1253_vm0, %v1252_v42  ;;  %v1200_v40 = vld [vmem:[%s1407_s5 + $0x18] sm:$0xff]   ;;  %s891_s5 = sshll.u32 %s1254_s0, 4  ;;  %s892_s5 = int_to_ptr.vmem [resolvable:$true] %s891_s5 }
  0x38   :  { %1070 = vmatprep.subr.bf16.mxu1 %v1252_v42  ;;  %s1223_s4 = scalar_lea.vmem %s892_s5, 128  ;;  %p1228_p9 = scmp.lt.s32.totalorder %s892_s5, %s892_s5 }
  0x39   :  { %1026 = vmatpush3.bf16.msra.mxu0 %v1166_v43  ;;  %p1224_p8 = scmp.ne.s32.totalorder %s892_s5, %s1223_s4  ;;  %p1229_p10 = scmp.lt.s32.totalorder %s1223_s4, %s1223_s4 }
  0x3a   :  { %1027 = vmatprep.subr.bf16.mxu0 %v1168_v45 }
  0x3b   :  { %1071 = vmatpush3.bf16.msra.mxu1 %v1167_v44  ;;  %p1230_p11 = por %p1229_p10, %p1228_p9 }
  0x3c   :  { %1072 = vmatprep.subr.bf16.mxu1 %v1252_v42 }
  0x3d   :  { %1028 = vmatpush3.bf16.msra.mxu0 %v1169_v46  ;;  %p1231_p12 = pnand %p1230_p11, %p1224_p8 }
  0x3e   :  { %1029 = vmatprep.subr.bf16.mxu0 %v1171_v48 }
  0x3f   :  { %1073 = vmatpush3.bf16.msra.mxu1 %v1170_v47 }
  0x40   :  { %1074 = vmatprep.subr.bf16.mxu1 %v1252_v42 }
  0x41   :  { %1030 = vmatpush3.bf16.msra.mxu0 %v1172_v49 }
  0x42   :  { %1031 = vmatprep.subr.bf16.mxu0 %v1174_v50 }
  0x43   :  { %1075 = vmatpush3.bf16.msra.mxu1 %v1173_v51 }
  0x44   :  { %1076 = vmatprep.subr.bf16.mxu1 %v1252_v42 }
  0x45   :  { %1032 = vmatpush3.bf16.msra.mxu0 %v1175_v52 }
  0x46   :  { %1033 = vmatprep.subr.bf16.mxu0 %v1177_v53 }
  0x47   :  { %1077 = vmatpush3.bf16.msra.mxu1 %v1176_v54 }
  0x48   :  { %1078 = vmatprep.subr.bf16.mxu1 %v1252_v42 }
  0x49   :  { %1034 = vmatpush3.bf16.msra.mxu0 %v1178_v55 }
  0x4a   :  { %1035 = vmatprep.subr.bf16.mxu0 %v1180_v56 }
  0x4b   :  { %1079 = vmatpush3.bf16.msra.mxu1 %v1179_v57 }
  0x4c   :  { %1080 = vmatprep.subr.bf16.mxu1 %v1252_v42 }
  0x4d   :  { %1036 = vmatpush3.bf16.msra.mxu0 %v1181_v58 }
  0x4e   :  { %1037 = vmatprep.subr.bf16.mxu0 %v1183_v62 }
  0x4f   :  { %1081 = vmatpush3.bf16.msra.mxu1 %v1182_v60 }
  0x50   :  { %1082 = vmatprep.subr.bf16.mxu1 %v1252_v42 }
  0x51   :  { %1038 = vmatpush3.bf16.msra.mxu0 %v1184_v63 }
  0x52   :  { %1088 = vmatprep.subr.bf16.mxu0 %v1252_v42 }
  0x53   :  { %1083 = vmatpush3.bf16.msra.mxu1 %v1187_v0 }
  0x54   :  { %639 = vmatmul.mubr.bf16.vlgmr.msra.gmra.mrb[4].mxu0 %v905_v1  ;;  %1108 = vmatprep.subr.bf16.mxu1 %v1252_v42 }
  0x55   :  { %1104 = vmatprep.mubr.msk.bf16.mxu0 %vm1253_vm0, %v1252_v42  ;;  %1089 = vmatpush3.bf16.msra.mxu0 %v1189_v3 }
  0x56   :  { %1085 = vmatmul.mubr.bf16.vlgmr.msra.gmra.mrb[4].mxu1 %v1188_v2  ;;  %1090 = vmatprep.subr.bf16.mxu0 %v1252_v42 }
  0x57   :  { %1116 = vmatprep.mubr.msk.bf16.mxu1 %vm1253_vm0, %v1252_v42  ;;  %1109 = vmatpush3.bf16.msra.mxu1 %v1197_v11 }
  0x58   :  { %1110 = vmatprep.subr.bf16.mxu1 %v1252_v42 }
  0x59   :  { %1091 = vmatpush3.bf16.msra.mxu0 %v1190_v4 }
  0x5a   :  { %1092 = vmatprep.subr.bf16.mxu0 %v1252_v42 }
  0x5b   :  { %1111 = vmatpush3.bf16.msra.mxu1 %v1198_v12 }
  0x5c   :  { %1112 = vmatprep.subr.bf16.mxu1 %v1252_v42 }
  0x5d   :  { %1093 = vmatpush3.bf16.msra.mxu0 %v1191_v5 }
  0x5e   :  { %1094 = vmatprep.subr.bf16.mxu0 %v1252_v42 }
  0x5f   :  { %1113 = vmatpush3.bf16.msra.mxu1 %v1199_v39 }
  0x60   :  { %1114 = vmatprep.subr.bf16.mxu1 %v1252_v42 }
  0x61   :  { %1095 = vmatpush3.bf16.msra.mxu0 %v1192_v6 }
  0x62   :  { %1096 = vmatprep.subr.bf16.mxu0 %v1252_v42 }
  0x63   :  { %1115 = vmatpush3.bf16.msra.mxu1 %v1200_v40 }
  0x65   :  { %1097 = vmatpush3.bf16.msra.mxu0 %v1193_v7 }
  0x66   :  { %1098 = vmatprep.subr.bf16.mxu0 %v1252_v42 }
  0x69   :  { %1099 = vmatpush3.bf16.msra.mxu0 %v1194_v8 }
  0x6a   :  { %1100 = vmatprep.subr.bf16.mxu0 %v1252_v42 }
  0x6d   :  { %1101 = vmatpush3.bf16.msra.mxu0 %v1195_v9 }
  0x6e   :  { %1102 = vmatprep.subr.bf16.mxu0 %v1252_v42  ;;  %v973_v42 = vld [vmem:[%s1408_s6] ss:$0 sm:$0xff] }
  0x71   :  { %1103 = vmatpush3.bf16.msra.mxu0 %v1196_v10 }
 0x107   :  { %v995_v13 = vpop.f32.mrb[0].mxu0 }
 0x108   :  { %v996_v15 = vpop.f32.mrb[1].mxu0 }
 0x109   :  { %v997_v16 = vadd.f32 %v996_v15, %v995_v13  ;;  %v998_v17 = vpop.f32.mrb[2].mxu0  ;;  %v1017_v18 = vpop.f32.mrb[0].mxu1 }
 0x10a   :  { %v999_v19 = vpop.f32.mrb[3].mxu0  ;;  %v1018_v20 = vpop.f32.mrb[1].mxu1 }
 0x10b   :  { %v561_v21 = vadd.f32 %v997_v16, %v900_v14  ;;  %v1019_v22 = vadd.f32 %v1018_v20, %v1017_v18  ;;  %v1020_v23 = vpop.f32.mrb[2].mxu1 }
 0x10c   :  { %v1021_v24 = vpop.f32.mrb[3].mxu1 }
 0x10d   :  { %v601_v25 = vadd.f32 %v1019_v22, %v561_v21 }
 0x127   :  { %v1039_v26 = vpop.f32.mrb[4].mxu0 }
 0x128   :  { %v1040_v27 = vpop.f32.mrb[5].mxu0 }
 0x129   :  { %v1041_v28 = vadd.f32 %v1040_v27, %v1039_v26  ;;  %v1042_v29 = vpop.f32.mrb[6].mxu0  ;;  %v680_v30 = vpop.f32.mrb[4].mxu1 }
 0x12a   :  { %v1043_v31 = vpop.f32.mrb[7].mxu0  ;;  %v1086_v32 = vpop.f32.mrb[5].mxu1 }
 0x12b   :  { %v641_v33 = vadd.f32 %v1041_v28, %v601_v25  ;;  %v683_v34 = vpop.f32.mrb[6].mxu1 }
 0x12c   :  { %v1087_v35 = vpop.f32.mrb[7].mxu1 }
 0x12d   :  { %v681_v36 = vadd.f32 %v680_v30, %v641_v33 }
 0x12f   :  { %v686_v37 = vmax.f32 %v681_v36, 0.0 }
 0x131   :  { %v687_v38 = vpack.c.bf16 %v686_v37, %v686_v37 }
 0x133   :  { %1105 = vmatmul.mubr.bf16.vlgmr.msra.gmra.mrb[8].mxu0 %v687_v38 }
 0x206   :  { %v793_v43 = vpop.f32.mrb[8].mxu0 }
 0x207   :  { %v794_v44 = vadd.f32 %v964_v41, %v793_v43  ;;  %v1106_v45 = vpop.f32.mrb[9].mxu0 }
 0x208   :  { %v796_v46 = vpop.f32.mrb[10].mxu0 }
 0x209   :  { %v799_v47 = vmax.f32 %v794_v44, 0.0  ;;  %v1107_v48 = vpop.f32.mrb[11].mxu0 }
 0x20b   :  { %v800_v49 = vpack.c.bf16 %v799_v47, %v799_v47 }
 0x20d   :  { %1117 = vmatmul.mubr.msk.bf16.vlgmr.msra.gmra.mrb[8].mxu1 %vm840_vm1, %v800_v49 }
 0x2e0   :  { %v878_v50 = vpop.f32.mrb[8].mxu1 }
 0x2e1   :  { %v879_v51 = vadd.f32 %v973_v42, %v878_v50  ;;  %v1118_v52 = vpop.f32.mrb[9].mxu1 }
 0x2e2   :  { %v881_v53 = vpop.f32.mrb[10].mxu1 }
 0x2e3   :  { %884 = vst [vmem:[#allocation5] sm:$0xff] %v879_v51  ;;  %v1119_v54 = vpop.f32.mrb[11].mxu1 }
 0x2e4   :  { %1234 = shalt.err (!%p1231_p12)
}
 0x2e5   :  { %s1235_s6 = scalar_lea.hbm %s1409_s7, 128 }
 0x2e6   :  { %p1236_p13 = scmp.ne.s32.totalorder %s1409_s7, %s1235_s6  ;;  %p1239_p0 = scmp.lt.u32.totalorder %s1235_s6, %s1409_s7 }
 0x2e8   :  { %p1241_p1 = pnand %p1239_p0, %p1236_p13 }
 0x2ea   :  { %1244 = shalt.err (!%p1241_p1)
}
 0x2eb   :  { %894 = dma.vmem_to_hbm [thread:$0]  %s892_s5, 128, %s1409_s7, [#allocation4]  }
 0x2ec   :  { %1247 = dma.done.wait [#allocation4], 128  }
 0x2ed   :  { %1248 = vsyncadd [#allocation4], 4294967168 }
 0x2ee   :  { %898 = vsyncpa [#allocation3], 1 }
 0x2ef   :  { %899 = vsyncpa [#allocation4], 1 }

</bundles_post_ra>
